<compile_context>
chip_gen: v7x
topology: tpu7x:2x2x1
jax: 0.10.0
libtpu: 0.0.40
codegen_flags: <defaults>
</compile_context>

<pallas_src>
import math

import jax
import jax.numpy as jnp
from jax.experimental import pallas as pl
from jax.experimental.pallas import tpu as pltpu


# Below this, skip the kernel entirely and return the free reshape.
_RESHAPE_ONLY_BYTES = 1 << 20
# Don't split the copy into concurrent DMAs smaller than this.
_MIN_BYTES_PER_CHUNK = 4 << 20


def _make_dma_copy_kernel(n_chunks: int, rows_per_chunk: int):
    """Kernel: direct HBM->HBM copy via `n_chunks` concurrent DMAs."""

    def kernel(x_ref, o_ref, sem):
        copies = []
        for c in range(n_chunks):
            sl = slice(c * rows_per_chunk, (c + 1) * rows_per_chunk)
            cp = pltpu.make_async_copy(x_ref.at[sl], o_ref.at[sl], sem.at[c])
            cp.start()
            copies.append(cp)
        for cp in copies:
            cp.wait()

    return kernel


def flat_forward(x: jax.Array, *, force_kernel: bool = False) -> jax.Array:
    """Equivalent of torch `x.view(x.size(0), -1)`.

    Default: metadata-only reshape for small payloads.  Otherwise (or when
    `force_kernel=True`) the data movement is done by a Pallas HBM->HBM DMA.
    """
    b = x.shape[0]
    d = math.prod(x.shape[1:]) if x.ndim > 1 else 1
    itemsize = jnp.dtype(x.dtype).itemsize
    total_bytes = b * d * itemsize

    # Free, row-major reshape: identical element order to torch .view on a
    # contiguous NCHW tensor.
    x2d = x.reshape(b, d)

    if not force_kernel and total_bytes < _RESHAPE_ONLY_BYTES:
        # Pure-metadata fast path: no HBM traffic at all.
        return x2d

    # Pick the number of concurrent DMA chunks (contiguous row ranges).
    n_chunks = 1
    if total_bytes >= 2 * _MIN_BYTES_PER_CHUNK:
        for n in (8, 4, 2):
            if b % n == 0 and (total_bytes // n) >= _MIN_BYTES_PER_CHUNK:
                n_chunks = n
                break
    rows_per_chunk = b // n_chunks

    return pl.pallas_call(
        _make_dma_copy_kernel(n_chunks, rows_per_chunk),
        out_shape=jax.ShapeDtypeStruct((b, d), x.dtype),
        in_specs=[pl.BlockSpec(memory_space=pl.ANY)],    # raw HBM ref, no auto-DMA
        out_specs=pl.BlockSpec(memory_space=pl.ANY),     # output stays in HBM
        scratch_shapes=[pltpu.SemaphoreType.DMA((n_chunks,))],
    )(x2d)


if __name__ == "__main__":
    key = jax.random.PRNGKey(0)
    # Small NCHW input consistent with the module's expected conv-style input.
    x = jax.random.normal(key, (2, 4, 16, 16), dtype=jnp.float32)

    # Exercise the Pallas HBM->HBM DMA path explicitly.
    out = jax.block_until_ready(flat_forward(x, force_kernel=True))

    ref = x.reshape(x.shape[0], -1)
    assert out.shape == (2, 4 * 16 * 16)
    assert out.dtype == x.dtype
    assert bool(jnp.array_equal(out, ref))

    # Default (metadata-only) fast path is also correct.
    out_fast = jax.block_until_ready(flat_forward(x))
    assert out_fast.shape == ref.shape
    assert bool(jnp.array_equal(out_fast, ref))

    print("KERNEL_OK")
</pallas_src>

<mosaic_0001>
module attributes {stable_mosaic.version = 11 : i64} {
  func.func @kernel(%arg0: memref<2x1024xf32, #tpu.memory_space<any>>, %arg1: memref<2x1024xf32, #tpu.memory_space<any>>, %arg2: memref<1x!tpu.dma_semaphore, #tpu.memory_space<semaphore_mem>>) attributes {dimension_semantics = [], scalar_prefetch = 0 : i64, scratch_operands = 1 : i64, tpu.core_type = #tpu.core_type<tc>} {
    %c0_i32 = arith.constant 0 : i32
    %c0_i32_0 = arith.constant 0 : i32
    %c0_i32_1 = arith.constant 0 : i32
    %0 = tpu.memref_slice %arg0[%c0_i32_0, %c0_i32_1] : memref<2x1024xf32, #tpu.memory_space<any>> -> memref<2x1024xf32, #tpu.memory_space<any>>
    %c0_i32_2 = arith.constant 0 : i32
    %c0_i32_3 = arith.constant 0 : i32
    %1 = tpu.memref_slice %arg1[%c0_i32_2, %c0_i32_3] : memref<2x1024xf32, #tpu.memory_space<any>> -> memref<2x1024xf32, #tpu.memory_space<any>>
    %2 = tpu.memref_slice %arg2[%c0_i32] : memref<1x!tpu.dma_semaphore, #tpu.memory_space<semaphore_mem>> -> memref<1x!tpu.dma_semaphore, #tpu.memory_space<semaphore_mem>>
    %3 = tpu.memref_squeeze %2 : memref<1x!tpu.dma_semaphore, #tpu.memory_space<semaphore_mem>> -> memref<!tpu.dma_semaphore, #tpu.memory_space<semaphore_mem>>
    tpu.enqueue_dma source(%0 : memref<2x1024xf32, #tpu.memory_space<any>>) target(%1 : memref<2x1024xf32, #tpu.memory_space<any>>) target_semaphore(%3 : memref<!tpu.dma_semaphore, #tpu.memory_space<semaphore_mem>>)
    %c0_i32_4 = arith.constant 0 : i32
    %c0_i32_5 = arith.constant 0 : i32
    %c0_i32_6 = arith.constant 0 : i32
    %4 = tpu.memref_slice %arg0[%c0_i32_5, %c0_i32_6] : memref<2x1024xf32, #tpu.memory_space<any>> -> memref<2x1024xf32, #tpu.memory_space<any>>
    %c0_i32_7 = arith.constant 0 : i32
    %c0_i32_8 = arith.constant 0 : i32
    %5 = tpu.memref_slice %arg1[%c0_i32_7, %c0_i32_8] : memref<2x1024xf32, #tpu.memory_space<any>> -> memref<2x1024xf32, #tpu.memory_space<any>>
    %6 = tpu.memref_slice %arg2[%c0_i32_4] : memref<1x!tpu.dma_semaphore, #tpu.memory_space<semaphore_mem>> -> memref<1x!tpu.dma_semaphore, #tpu.memory_space<semaphore_mem>>
    %7 = tpu.memref_squeeze %6 : memref<1x!tpu.dma_semaphore, #tpu.memory_space<semaphore_mem>> -> memref<!tpu.dma_semaphore, #tpu.memory_space<semaphore_mem>>
    tpu.wait_dma2 semaphore(%7 : memref<!tpu.dma_semaphore, #tpu.memory_space<semaphore_mem>>) src(%4 : memref<2x1024xf32, #tpu.memory_space<any>>) dst(%5 : memref<2x1024xf32, #tpu.memory_space<any>>)
    return
  }
}

</mosaic_0001>

<bundles_post_ra>
// kernel: tpu_custom_call.1
= control target key start
LH: loop header
LB: loop body
LE: loop exit
PB: predicated region body
PF: predicated region fallthrough
CT: control target
= control target key end

     0   :  { %s35_s6 = smov [#allocation2]   ;;  %s36_s7 = smov [#allocation3]   ;;  %s54_s0 = inlined_call_operand.hbm [shape: f32[2,1024], index: 0, kind: input, shape index: {}]   ;;  %s55_s1 = inlined_call_operand.hbm [shape: f32[2,1024], index: 1, kind: output, shape index: {}]  }
   0x1   :  { %s37_s8 = smov 0  }
   0x2   :  { %18 = dma.general %s54_s0, 256, %s55_s1, %s35_s6, %s36_s7, [#allocation4], %s37_s8, 0  }
   0x3   :  { %33 = dma.done.wait [#allocation2], 256 }
   0x4   :  { %34 = vsyncadd [#allocation2], 4294967040 }
   0x5   :  { %23 = vsyncmov [#allocation2] }
   0x8   :  { %s24_s13 = vpop.sfrf %23 }
   0x9   :  { %p29_p0 = scmp.ne.s32.totalorder %s24_s13, 0 }
   0xb   :  { %28 = shalt.err (%p29_p0)  }

</bundles_post_ra>
